<compile_context>
chip_gen: v5e
topology: v5e:2x2
jax: 0.10.0
libtpu: 0.0.40
codegen_flags: <defaults>
</compile_context>

<pallas_src>
import jax
import jax.numpy as jnp
from jax import lax
from jax.experimental import pallas as pl
from jax.experimental.pallas import tpu as pltpu

_LANE = 128


def _round_up(n, m):
    return ((n + m - 1) // m) * m


def _onehot_dict_kernel(x_ref, dict_ref, o_ref):
    # x_ref:    (TM, Vp) logits tile (vocab padded with -inf to a lane multiple)
    # dict_ref: (Vp, Ep) embedding table, fully resident, single-buffered
    # o_ref:    (TM, Ep) output tile
    x = x_ref[...]
    tm, v = x.shape

    # First-occurrence argmax (torch.argmax tie-breaking):
    #   idx = min over columns of (col where x == rowmax else Vp)
    col = lax.broadcasted_iota(jnp.int32, (tm, v), 1)
    row_max = jnp.max(x, axis=-1, keepdims=True)
    cand = jnp.where(x == row_max, col, v)
    idx = jnp.min(cand, axis=-1, keepdims=True)            # (TM, 1)

    one_hot = (col == idx).astype(dict_ref.dtype)           # (TM, Vp)
    o_ref[...] = jnp.dot(
        one_hot, dict_ref[...], preferred_element_type=jnp.float32
    ).astype(o_ref.dtype)


def one_hot_dictionary(x, dictionary, *, tile_rows=None, vmem_capacity_bytes=None):
    """x: [B, N, V] float logits; dictionary: [V, E] float -> [B, N, E]."""
    B, N, V = x.shape
    Vd, E = dictionary.shape
    assert V == Vd, "vocab size mismatch between x and dictionary"
    R = B * N

    Vp = _round_up(V, _LANE)      # lane-dense logit loads
    Ep = _round_up(E, _LANE)      # lane-dense output stores

    x2 = x.reshape(R, V)
    if Vp != V:
        # -inf padding never wins the argmax (all -inf rows still resolve to col 0).
        x2 = jnp.pad(x2, ((0, 0), (0, Vp - V)), constant_values=-jnp.inf)
    d = dictionary
    if Vp != V or Ep != E:
        d = jnp.pad(d, ((0, Vp - V), (0, Ep - E)))

    x_bytes = jnp.dtype(x2.dtype).itemsize
    d_bytes = jnp.dtype(d.dtype).itemsize
    row_mult = max(8, 32 // x_bytes)            # sublane packing: f32->8, bf16->16, i8->32

    # --- VMEM budgeting / tile selection (v5e/v6e: 128 MiB, v7x: 64 MiB per core).
    if vmem_capacity_bytes is None:
        try:
            vmem_capacity_bytes = int(pltpu.get_tpu_info().vmem_capacity_bytes)
        except Exception:
            vmem_capacity_bytes = 64 * 1024 * 1024   # conservative (v7x per-core VMEM)
    budget = int(vmem_capacity_bytes * 0.6)          # headroom for compiler scratch

    per_row = 2 * Vp * x_bytes + 2 * Ep * d_bytes    # double-buffered x tile + out tile
    fixed = Vp * Ep * d_bytes                        # single-buffered resident dictionary

    if tile_rows is None:
        avail = max(budget - fixed, per_row * row_mult)
        tm = (avail // per_row) // row_mult * row_mult
        tm = int(max(row_mult, min(1024, tm)))
        tm = min(tm, _round_up(R, row_mult))         # no point tiling past the data
        # Keep >= 2 grid steps where possible so v7x's two TensorCores both get work.
        while tm > row_mult and pl.cdiv(R, tm) < 2:
            tm = max(row_mult, (tm // 2 // row_mult) * row_mult)
        tile_rows = tm
    else:
        tile_rows = max(row_mult, (tile_rows // row_mult) * row_mult)

    grid = (pl.cdiv(R, tile_rows),)
    needed = fixed + per_row * tile_rows
    vmem_limit = int(min(vmem_capacity_bytes - (4 << 20), needed + (8 << 20)))
    vmem_limit = max(vmem_limit, 32 << 20)

    out_shape = jax.ShapeDtypeStruct((R, Ep), d.dtype)
    x_spec = pl.BlockSpec((tile_rows, Vp), lambda i: (i, 0))
    out_spec = pl.BlockSpec((tile_rows, Ep), lambda i: (i, 0))

    def call(dict_pipeline_mode):
        kwargs = {} if dict_pipeline_mode is None else {"pipeline_mode": dict_pipeline_mode}
        dict_spec = pl.BlockSpec((Vp, Ep), lambda i: (0, 0), **kwargs)
        return pl.pallas_call(
            _onehot_dict_kernel,
            out_shape=out_shape,
            grid_spec=pltpu.PrefetchScalarGridSpec(
                num_scalar_prefetch=0,
                grid=grid,
                in_specs=[x_spec, dict_spec],
                out_specs=out_spec,
            ),
            compiler_params=pltpu.CompilerParams(
                dimension_semantics=("parallel",),
                vmem_limit_bytes=vmem_limit,
            ),
        )(x2, d)

    try:
        # The dictionary block never changes across the grid -> single-buffer it.
        out = call(pl.Buffered(1))
    except Exception:
        # Fallback: default double-buffering (more VMEM, identical result).
        out = call(None)

    return out[:, :E].reshape(B, N, E)


if __name__ == "__main__":
    # Small shapes consistent with the module: B=2, N(tokens)=8, vocab=16, emb=32
    B, N, V, E = 2, 8, 16, 32
    key = jax.random.PRNGKey(0)
    kx, kd = jax.random.split(key)

    x = jax.random.normal(kx, (B, N, V), dtype=jnp.float32)
    # nn.Embedding default init: N(0, 1)
    dictionary = jax.random.normal(kd, (V, E), dtype=jnp.float32)

    out = one_hot_dictionary(x, dictionary)
    out = jax.block_until_ready(out)

    # Reference in plain JAX (argmax + take), same semantics as torch.
    tokens = jnp.argmax(x, axis=-1)
    ref = jnp.take(dictionary, tokens, axis=0)
    assert out.shape == (B, N, E)
    assert out.dtype == dictionary.dtype
    assert jnp.array_equal(out, ref), "Pallas kernel mismatch vs reference"

    print("KERNEL_OK")
</pallas_src>

<mosaic_0001>
module attributes {stable_mosaic.version = 11 : i64} {
  func.func @_onehot_dict_kernel(%arg0: i32, %arg1: memref<8x128xf32, #tpu.memory_space<vmem>>, %arg2: memref<128x128xf32, #tpu.memory_space<vmem>>, %arg3: memref<8x128xf32, #tpu.memory_space<vmem>>) attributes {dimension_semantics = [#tpu.dimension_semantics<parallel>], iteration_bounds = array<i64: 2>, scalar_prefetch = 0 : i64, scratch_operands = 0 : i64, tpu.core_type = #tpu.core_type<tc>, window_params = [{transform_indices = @transform_0, window_bounds = array<i64: 8, 128>}, {pipeline_mode = #tpu.pipeline_mode<synchronous>, transform_indices = @transform_1, window_bounds = array<i64: 128, 128>}, {transform_indices = @transform_2, window_bounds = array<i64: 8, 128>}]} {
    %c0 = arith.constant 0 : index
    %c0_0 = arith.constant 0 : index
    %0 = vector.load %arg1[%c0, %c0_0] : memref<8x128xf32, #tpu.memory_space<vmem>>, vector<8x128xf32>
    %1 = tpu.iota {dimensions = array<i32: 1>} : vector<8x128xi32>
    %cst = arith.constant dense<0xFF800000> : vector<8xf32>
    %2 = vector.multi_reduction <maximumf>, %0, %cst [1] : vector<8x128xf32> to vector<8xf32>
    %3 = vector.shape_cast %2 : vector<8xf32> to vector<8x1xf32>
    %4 = vector.broadcast %3 : vector<8x1xf32> to vector<8x128xf32>
    %5 = arith.cmpf oeq, %0, %4 : vector<8x128xf32>
    %c128_i32 = arith.constant 128 : i32
    %6 = vector.broadcast %c128_i32 : i32 to vector<8x128xi32>
    %7 = arith.select %5, %1, %6 : vector<8x128xi1>, vector<8x128xi32>
    %cst_1 = arith.constant dense<2147483647> : vector<8xi32>
    %8 = vector.multi_reduction <minsi>, %7, %cst_1 [1] : vector<8x128xi32> to vector<8xi32>
    %9 = vector.shape_cast %8 : vector<8xi32> to vector<8x1xi32>
    %10 = vector.broadcast %9 : vector<8x1xi32> to vector<8x128xi32>
    %11 = arith.cmpi eq, %1, %10 : vector<8x128xi32>
    %12 = arith.extui %11 : vector<8x128xi1> to vector<8x128xi32>
    %13 = arith.sitofp %12 : vector<8x128xi32> to vector<8x128xf32>
    %c0_2 = arith.constant 0 : index
    %c0_3 = arith.constant 0 : index
    %14 = vector.load %arg2[%c0_2, %c0_3] : memref<128x128xf32, #tpu.memory_space<vmem>>, vector<128x128xf32>
    %cst_4 = arith.constant dense<0.000000e+00> : vector<8x128xf32>
    %15 = tpu.matmul %13, %14, %cst_4 {dimension_numbers = #tpu.dot_dimension_numbers<[1], [0], [0], [1], [0, 0, 1, 1], [], []>} : vector<8x128xf32>, vector<128x128xf32>, vector<8x128xf32> -> vector<8x128xf32>
    %c0_5 = arith.constant 0 : index
    %c0_6 = arith.constant 0 : index
    %16 = vector.load %arg3[%c0_5, %c0_6] : memref<8x128xf32, #tpu.memory_space<vmem>>, vector<8x128xf32>
    tpu.vector_store %arg3[%c0_5, %c0_6], %15 {strides = array<i32>} : memref<8x128xf32, #tpu.memory_space<vmem>>, vector<8x128xf32>,
    return
  }
  func.func @transform_0(%arg0: i32) -> (i32, i32) {
    %c0_i32 = arith.constant 0 : i32
    %c0_i32_0 = arith.constant 0 : i32
    return %arg0, %c0_i32 : i32, i32
  }
  func.func @transform_1(%arg0: i32) -> (i32, i32) {
    %c0_i32 = arith.constant 0 : i32
    %c0_i32_0 = arith.constant 0 : i32
    %c0_i32_1 = arith.constant 0 : i32
    return %c0_i32, %c0_i32_0 : i32, i32
  }
  func.func @transform_2(%arg0: i32) -> (i32, i32) {
    %c0_i32 = arith.constant 0 : i32
    %c0_i32_0 = arith.constant 0 : i32
    return %arg0, %c0_i32 : i32, i32
  }
}

module attributes {stable_mosaic.version = 11 : i64} {
  func.func @_onehot_dict_kernel(%arg0: i32, %arg1: memref<8x128xf32, #tpu.memory_space<vmem>>, %arg2: memref<128x128xf32, #tpu.memory_space<vmem>>, %arg3: memref<8x128xf32, #tpu.memory_space<vmem>>) attributes {dimension_semantics = [#tpu.dimension_semantics<parallel>], iteration_bounds = array<i64: 2>, scalar_prefetch = 0 : i64, scratch_operands = 0 : i64, tpu.core_type = #tpu.core_type<tc>, window_params = [{transform_indices = @transform_0, window_bounds = array<i64: 8, 128>}, {pipeline_mode = #tpu.pipeline_mode<synchronous>, transform_indices = @transform_1, window_bounds = array<i64: 128, 128>}, {transform_indices = @transform_2, window_bounds = array<i64: 8, 128>}]} {
    %c0 = arith.constant 0 : index
    %c0_0 = arith.constant 0 : index
    %0 = vector.load %arg1[%c0, %c0_0] : memref<8x128xf32, #tpu.memory_space<vmem>>, vector<8x128xf32>
    %1 = tpu.iota {dimensions = array<i32: 1>} : vector<8x128xi32>
    %cst = arith.constant dense<0xFF800000> : vector<8xf32>
    %2 = vector.multi_reduction <maximumf>, %0, %cst [1] : vector<8x128xf32> to vector<8xf32>
    %3 = vector.shape_cast %2 : vector<8xf32> to vector<8x1xf32>
    %4 = vector.broadcast %3 : vector<8x1xf32> to vector<8x128xf32>
    %5 = arith.cmpf oeq, %0, %4 : vector<8x128xf32>
    %c128_i32 = arith.constant 128 : i32
    %6 = vector.broadcast %c128_i32 : i32 to vector<8x128xi32>
    %7 = arith.select %5, %1, %6 : vector<8x128xi1>, vector<8x128xi32>
    %cst_1 = arith.constant dense<2147483647> : vector<8xi32>
    %8 = vector.multi_reduction <minsi>, %7, %cst_1 [1] : vector<8x128xi32> to vector<8xi32>
    %9 = vector.shape_cast %8 : vector<8xi32> to vector<8x1xi32>
    %10 = vector.broadcast %9 : vector<8x1xi32> to vector<8x128xi32>
    %11 = arith.cmpi eq, %1, %10 : vector<8x128xi32>
    %12 = arith.extui %11 : vector<8x128xi1> to vector<8x128xi32>
    %13 = arith.sitofp %12 : vector<8x128xi32> to vector<8x128xf32>
    %c0_2 = arith.constant 0 : index
    %c0_3 = arith.constant 0 : index
    %14 = vector.load %arg2[%c0_2, %c0_3] : memref<128x128xf32, #tpu.memory_space<vmem>>, vector<128x128xf32>
    %cst_4 = arith.constant dense<0.000000e+00> : vector<8x128xf32>
    %15 = tpu.matmul %13, %14, %cst_4 {dimension_numbers = #tpu.dot_dimension_numbers<[1], [0], [0], [1], [0, 0, 1, 1], [], []>} : vector<8x128xf32>, vector<128x128xf32>, vector<8x128xf32> -> vector<8x128xf32>
    %c0_5 = arith.constant 0 : index
    %c0_6 = arith.constant 0 : index
    %16 = vector.load %arg3[%c0_5, %c0_6] : memref<8x128xf32, #tpu.memory_space<vmem>>, vector<8x128xf32>
    tpu.vector_store %arg3[%c0_5, %c0_6], %15 {strides = array<i32>} : memref<8x128xf32, #tpu.memory_space<vmem>>, vector<8x128xf32>,
    return
  }
  func.func @transform_0(%arg0: i32) -> (i32, i32) {
    %c0_i32 = arith.constant 0 : i32
    %c0_i32_0 = arith.constant 0 : i32
    return %arg0, %c0_i32 : i32, i32
  }
  func.func @transform_1(%arg0: i32) -> (i32, i32) {
    %c0_i32 = arith.constant 0 : i32
    %c0_i32_0 = arith.constant 0 : i32
    %c0_i32_1 = arith.constant 0 : i32
    return %c0_i32, %c0_i32_0 : i32, i32
  }
  func.func @transform_2(%arg0: i32) -> (i32, i32) {
    %c0_i32 = arith.constant 0 : i32
    %c0_i32_0 = arith.constant 0 : i32
    return %arg0, %c0_i32 : i32, i32
  }
}

</mosaic_0001>

<bundles_post_ra>
// kernel: tpu_custom_call.1
= control target key start
LH: loop header
LB: loop body
LE: loop exit
PB: predicated region body
PF: predicated region fallthrough
CT: control target
= control target key end

     0   :  { %7 = vsyncpa [#allocation3], 0  ;;  %s702_s0 = inlined_call_operand.hbm [shape: f32[16,128], index: 0, kind: input, shape index: {}]   ;;  %s703_s1 = inlined_call_operand.hbm [shape: f32[128,128], index: 1, kind: input, shape index: {}]   ;;  %s704_s2 = inlined_call_operand.hbm [shape: f32[16,128], index: 2, kind: output, shape index: {}]  }
   0x1   :  { %9 = vsyncpa [#allocation3 + $0x1], 0 }
   0x2   :  { %10 = vsyncpa [#allocation6], 0 }
   0x3   :  { %11 = vsyncpa [#allocation4], 0 }
   0x4   :  { %13 = vsyncpa [#allocation4 + $0x1], 0  ;;  %s562_s9 = smov 0   ;;  %s564_s10 = smov 0  }
   0x5   :  { %s566_s11 = smov 0   ;;  %s568_s12 = smov 0  }
   0x6 LB: > { %s108_s15 = sshll.u32 %s703_s1, 4  ;;  %s586_s16 = sadd.s32 4294967295, %s541_s12   ;;  %s541_s12 = sphi %s568_s12, %s714_s12   ;;  %s537_s11 = sphi %s566_s11, %s713_s11   ;;  %s533_s10 = sphi %s564_s10, %s712_s10   ;;  %s529_s9 = sphi %s562_s9, %s711_s9   ;;  %s109_s15 = int_to_ptr.hbm [resolvable:$true] %s108_s15 }
   0x7   : > { %p336_p0 = scmp.ge.s32.totalorder %s541_s12, 1  ;;  %p40_p1 = scmp.eq.s32.totalorder %s586_s16, 0 }
   0x8   : > { %p97_p2 = scmp.lt.s32.totalorder %s541_s12, 3  ;;  %s543_s18 = smov [#allocation5]  }
   0x9   : > { %s110_s19 = sshll.u32 %s543_s18, 4  ;;  %s544_s20 = smov 128   ;;  %s111_s19 = int_to_ptr.vmem [resolvable:$true] %s110_s19 }
   0xa   : > { %p591_p3 = pnand %p336_p0, %p97_p2  ;;  %s545_s21 = smov 8  }
   0xb   : > { %s335_s22 = sadd.s32 4294967294, %s541_s12   ;;  %s602_s23 = sadd.s32 1, %s541_s12  }
   0xc   : > { %p359_p4 = pneg %p591_p3  ;;  %s26_s24 = sadd.s32 1, %s537_s11 }
   0xd   : > { %s23_s25 = ssub.s32 %s541_s12, %s602_s23  ;;  %p33_p7 = scmp.ne.s32.totalorder %s537_s11, %s533_s10 }
   0xe   : > { %p360_p6 = pnand %p359_p4, %p40_p1  ;;  %p24_p8 = scmp.eq.s32.totalorder %s23_s25, 0 }
   0xf   : > { %p34_p9 = scmp.eq.s32.totalorder %s541_s12, 0  ;;  %p39_p10 = scmp.ne.s32.totalorder %s533_s10, %s529_s9 }
  0x10   : > { %362 = dma.hbm_to_vmem [thread:$0]  (!%p360_p6), %s109_s15, 2048, %s111_s19, [#allocation6], %s544_s20, %s544_s20, %s545_s21  }
  0x11   : > { %p84_p11 = scmp.eq.s32.totalorder %s586_s16, 1  ;;  %p618_p12 = por %p40_p1, %p39_p10 }
  0x12   : > { %s614_s26 = scalar_select %p24_p8, %s537_s11, %s26_s24  }
  0x13   : > { %p622_p13 = por %p84_p11, %p33_p7  ;;  %p90_p0 = scmp.eq.s32.totalorder %s335_s22, 1 }
  0x14   : > { %p35_p2 = por %p34_p9, %p33_p7  ;;  %s124_s29 = sand.u32 1, %s537_s11  }
  0x15   : > { %p627_p4 = por %p90_p0, %p39_p10  ;;  %p372_p6 = scmp.lt.s32.totalorder %s541_s12, 2 }
  0x16   : > { %s339_s3 = sshll.u32 %s124_s29, 3  ;;  %s340_s4 = sshll.u32 %s541_s12, 3 }
  0x17   : > { %s132_s7 = scalar_lea.hbm %s702_s0, %s340_s4  ;;  %s128_s13 = scalar_lea.vmem [#allocation2], %s339_s3 }
  0x18   : > { %s134_s8 = sshll.u32 %s132_s7, 4  ;;  %s136_s14 = sshll.u32 %s128_s13, 4  ;;  %s135_s8 = int_to_ptr.hbm [resolvable:$true] %s134_s8  ;;  %s137_s14 = int_to_ptr.vmem [resolvable:$true] %s136_s14 }
  0x19   : > { %p636_p8 = pnand %p372_p6, %p35_p2  ;;  %s125_s18 = scalar_lea.sflag [#allocation3], %s124_s29 }
  0x1a   : > { %s441_s19 = sshra.s32 %s135_s8, 4  ;;  %s448_s24 = scalar_lea.hbm %s702_s0, 16  ;;  %s442_s19 = int_to_ptr.hbm [resolvable:$true] %s441_s19 }
  0x1b   : > { %s443_s20 = scalar_lea.hbm %s442_s19, 8  ;;  %p445_p9 = pneg %p636_p8 }
  0x1c   : > { %p444_p7 = scmp.ne.s32.totalorder %s442_s19, %s443_s20  ;;  %p449_p0 = scmp.lt.s32.totalorder %s442_s19, %s702_s0 }
  0x1d   : > { %p450_p2 = scmp.lt.s32.totalorder %s448_s24, %s443_s20 }
  0x1e   : > { %p446_p10 = pnand %p445_p9, %p444_p7 }
  0x1f   : > { %p451_p6 = por %p450_p2, %p449_p0 }
  0x20   : > { %p447_p11 = pneg %p446_p10 }
  0x22   : > { %p452_p5 = pnand %p451_p6, %p447_p11 }
  0x24   : > { %455 = shalt.err (!%p452_p5)
}
  0x25   : > { %366 = dma.hbm_to_vmem [thread:$0]  (!%p636_p8), %s135_s8, 128, %s137_s14, %s125_s18  }
  0x26   : > { %145 = sbr.rel (%p591_p3) target bundleno = 537 (0x219), region = 28  ;;  %s653_s29 = sand.u32 (!%p591_p3), 1, %s533_s10  }
  0x27   : > { %s342_s4 = sshll.u32 (!%p591_p3), %s653_s29, 3  ;;  %s148_s5 = scalar_lea.sflag (!%p591_p3), [#allocation3], %s653_s29 }
  0x28   : > { %s151_s6 = scalar_lea.vmem (!%p591_p3), [#allocation2], %s342_s4 }
  0x2b   : > { %516 = dma.done.wait (%p618_p12), %s148_s5, 128  }
  0x2c   : > { %518 = vsyncadd (%p618_p12), %s148_s5, 4294967168 }
  0x2d   : > { %520 = dma.done.wait (%p40_p1), [#allocation6], 2048  }
  0x2e   : > { %522 = vsyncadd (%p40_p1), [#allocation6], 4294965248  ;;  %v178_v0 = vld [vmem:[%s151_s6] sm:$0xff]  ;;  %v179_v1 = vlaneseq  ;;  %v215_v9 = vld [vmem:[#allocation5 + $0x68] sm:$0xff]  ;;  %v546_v32 = vmov 1.0   ;;  %s348_s17 = sshll.u32 %s586_s16, 3 }
  0x2f   : > { %181 = vmax.xlane.f32.xlu0 %v178_v0  ;;  %v217_v7 = vld [vmem:[#allocation5 + $0x78] sm:$0xff]  ;;  %v216_v8 = vld [vmem:[#allocation5 + $0x70] sm:$0xff]  ;;  %v214_v10 = vld [vmem:[#allocation5 + $0x60] sm:$0xff]  ;;  %s250_s8 = scalar_lea.hbm %s704_s2, %s348_s17  ;;  %s177_s13 = scalar_lea.vmem [#allocation7], %s342_s4 }
  0x30   : > { %v180_v2 = vand.u32 127, %v179_v1  ;;  %218 = vmatpush.msra.mxu0 %v217_v7  ;;  %v213_v11 = vld [vmem:[#allocation5 + $0x58] sm:$0xff]  ;;  %v212_v12 = vld [vmem:[#allocation5 + $0x50] sm:$0xff]  ;;  %v211_v13 = vld [vmem:[#allocation5 + $0x48] sm:$0xff]  ;;  %s252_s14 = sshll.u32 %s177_s13, 4  ;;  %s254_s15 = sshll.u32 %s250_s8, 4  ;;  %s253_s14 = int_to_ptr.vmem [resolvable:$true] %s252_s14  ;;  %s255_s15 = int_to_ptr.hbm [resolvable:$true] %s254_s15 }
  0x31   : > { %v210_v14 = vld [vmem:[#allocation5 + $0x40] sm:$0xff]  ;;  %v209_v15 = vld [vmem:[#allocation5 + $0x38] sm:$0xff]  ;;  %v208_v16 = vld [vmem:[#allocation5 + $0x30] sm:$0xff]  ;;  %s240_s18 = scalar_lea.sflag [#allocation4], %s653_s29  ;;  %s485_s19 = sshra.s32 %s255_s15, 4  ;;  %s486_s19 = int_to_ptr.hbm [resolvable:$true] %s485_s19 }
  0x32   : > { %219 = vmatpush.msra.mxu0 %v216_v8  ;;  %v207_v17 = vld [vmem:[#allocation5 + $0x28] sm:$0xff]  ;;  %v206_v18 = vld [vmem:[#allocation5 + $0x20] sm:$0xff]  ;;  %v205_v19 = vld [vmem:[#allocation5 + $0x18] sm:$0xff]  ;;  %s487_s20 = scalar_lea.hbm %s486_s19, 8  ;;  %s491_s22 = scalar_lea.hbm %s704_s2, 16 }
  0x33   : > { %v204_v24 = vld [vmem:[#allocation5 + $0x10] sm:$0xff]  ;;  %v203_v25 = vld [vmem:[#allocation5 + $0x8] sm:$0xff]  ;;  %v202_v26 = vld [vmem:[#allocation5] sm:$0xff]  ;;  %p488_p1 = scmp.ne.s32.totalorder %s486_s19, %s487_s20  ;;  %p492_p12 = scmp.lt.s32.totalorder %s486_s19, %s704_s2 }
  0x34   : > { %220 = vmatpush.msra.mxu0 %v215_v9  ;;  %p493_p8 = scmp.lt.s32.totalorder %s491_s22, %s487_s20 }
  0x35   : > { %p489_p3 = pnand %p488_p1, %p622_p13 }
  0x36   : > { %221 = vmatpush.msra.mxu0 %v214_v10  ;;  %p494_p7 = por %p493_p8, %p492_p12 }
  0x37   : > { %p490_p5 = pneg %p489_p3 }
  0x38   : > { %222 = vmatpush.msra.mxu0 %v213_v11 }
  0x39   : > { %p495_p9 = pnand %p494_p7, %p490_p5 }
  0x3a   : > { %223 = vmatpush.msra.mxu0 %v212_v12 }
  0x3c   : > { %224 = vmatpush.msra.mxu0 %v211_v13 }
  0x3e   : > { %225 = vmatpush.msra.mxu0 %v210_v14 }
  0x40   : > { %226 = vmatpush.msra.mxu0 %v209_v15 }
  0x42   : > { %227 = vmatpush.msra.mxu0 %v208_v16 }
  0x44   : > { %228 = vmatpush.msra.mxu0 %v207_v17 }
  0x46   : > { %229 = vmatpush.msra.mxu0 %v206_v18 }
  0x48   : > { %230 = vmatpush.msra.mxu0 %v205_v19 }
  0x4a   : > { %231 = vmatpush.msra.mxu0 %v204_v24 }
  0x4c   : > { %232 = vmatpush.msra.mxu0 %v203_v25 }
  0x4e   : > { %233 = vmatpush.msra.mxu0 %v202_v26 }
  0xa2   : > { %v182_v3 = vpop.xlane.xlu0 %181 }
  0xa3   : > { %vm183_vm0 = vcmp.eq.f32.partialorder %v178_v0, %v182_v3 }
  0xa4   : > { %v184_v4 = vsel %vm183_vm0, %v180_v2, 128 }
  0xa5   : > { %v186_v5 = vshra.s32 %v184_v4, 16  ;;  %v185_v20 = vand.u32 65535, %v184_v4 }
  0xa7   : > { %v188_v6 = vcvt.s32.f32 %v186_v5  ;;  %v187_v22 = vcvt.s32.f32 %v185_v20 }
  0xa9   : > { %189 = vmin.xlane.f32.xlu0 %v188_v6 }
 0x11c   : > { %v190_v21 = vpop.xlane.xlu0 %189 }
 0x11d   : > { %vm191_vm1 = vcmp.eq.f32.partialorder %v188_v6, %v190_v21  ;;  %v196_v27 = vcvt.f32.s32 %v190_v21 }
 0x11e   : > { %v192_v23 = vsel %vm191_vm1, %v187_v22, inf }
 0x11f   : > { %193 = vmin.xlane.f32.xlu1 %v192_v23  ;;  %v197_v29 = vshll.u32 %v196_v27, 16 }
 0x192   : > { %v194_v28 = vpop.xlane.xlu1 %193 }
 0x193   : > { %v195_v30 = vcvt.f32.s32 %v194_v28 }
 0x195   : > { %v198_v31 = vadd.s32 %v197_v29, %v195_v30 }
 0x197   : > { %vm199_vm2 = vcmp.eq.s32.totalorder %v180_v2, %v198_v31 }
 0x198   : > { %346 = vmatmul.msk.f32.vlgmr.msra.gmra.mxu0 %vm199_vm2, %v546_v32 }
 0x215   : > { %v235_v33 = vpop.f32.mrf.mxu0 }
 0x216   : > { %238 = vst [vmem:[%s177_s13] sm:$0xff] %v235_v33 }
 0x217   : > { %498 = shalt.err (!%p495_p9)
}
 0x218   : > { %357 = dma.vmem_to_hbm [thread:$0]  (%p622_p13), %s253_s14, 128, %s255_s15, %s240_s18  }
 0x219 PF: > { %s266_s3 = sand.u32 1, %s529_s9   ;;  %p710_p10 = scmp.ge.s32.totalorder %s541_s12, 2 }
 0x21a   : > { %s267_s29 = scalar_lea.sflag [#allocation4], %s266_s3 }
 0x21b   : > { %p368_p11 = pnand %p710_p10, %p627_p4 }
 0x21d   : > { %p369_p0 = pneg %p368_p11 }
 0x21f   : > { %524 = dma.done.wait (%p369_p0), %s267_s29, 128  }
 0x220   : > { %526 = vsyncadd (%p369_p0), %s267_s29, 4294967168  ;;  %p16_p2 = scmp.ge.s32.totalorder %s602_s23, 4   ;;  %s711_s9 = smov %s533_s10 }
 0x221   : > { %s712_s10 = smov %s537_s11  ;;  %s713_s11 = smov %s614_s26 }
 0x222   : > { %s714_s12 = smov %s602_s23  ;;  %18 = sbr.rel (!%p16_p2) target bundleno = 6 (0x6), region = 77 }
 0x227   :  { %273 = vsyncpa [#allocation3], 1 }
 0x228   :  { %275 = vsyncpa [#allocation3 + $0x1], 1 }
 0x229   :  { %276 = vsyncpa [#allocation6], 1 }
 0x22a   :  { %277 = vsyncpa [#allocation4], 1 }
 0x22b   :  { %279 = vsyncpa [#allocation4 + $0x1], 1 }

// kernel: tpu_custom_call.1
= control target key start
LH: loop header
LB: loop body
LE: loop exit
PB: predicated region body
PF: predicated region fallthrough
CT: control target
= control target key end

     0   :  { %7 = vsyncpa [#allocation3], 0  ;;  %s702_s0 = inlined_call_operand.hbm [shape: f32[16,128], index: 0, kind: input, shape index: {}]   ;;  %s703_s1 = inlined_call_operand.hbm [shape: f32[128,128], index: 1, kind: input, shape index: {}]   ;;  %s704_s2 = inlined_call_operand.hbm [shape: f32[16,128], index: 2, kind: output, shape index: {}]  }
   0x1   :  { %9 = vsyncpa [#allocation3 + $0x1], 0 }
   0x2   :  { %10 = vsyncpa [#allocation6], 0 }
   0x3   :  { %11 = vsyncpa [#allocation4], 0 }
   0x4   :  { %13 = vsyncpa [#allocation4 + $0x1], 0  ;;  %s562_s9 = smov 0   ;;  %s564_s10 = smov 0  }
   0x5   :  { %s566_s11 = smov 0   ;;  %s568_s12 = smov 0  }
   0x6 LB: > { %s108_s15 = sshll.u32 %s703_s1, 4  ;;  %s586_s16 = sadd.s32 4294967295, %s541_s12   ;;  %s541_s12 = sphi %s568_s12, %s714_s12   ;;  %s537_s11 = sphi %s566_s11, %s713_s11   ;;  %s533_s10 = sphi %s564_s10, %s712_s10   ;;  %s529_s9 = sphi %s562_s9, %s711_s9   ;;  %s109_s15 = int_to_ptr.hbm [resolvable:$true] %s108_s15 }
   0x7   : > { %p336_p0 = scmp.ge.s32.totalorder %s541_s12, 1  ;;  %p40_p1 = scmp.eq.s32.totalorder %s586_s16, 0 }
   0x8   : > { %p97_p2 = scmp.lt.s32.totalorder %s541_s12, 3  ;;  %s543_s18 = smov [#allocation5]  }
   0x9   : > { %s110_s19 = sshll.u32 %s543_s18, 4  ;;  %s544_s20 = smov 128   ;;  %s111_s19 = int_to_ptr.vmem [resolvable:$true] %s110_s19 }
   0xa   : > { %p591_p3 = pnand %p336_p0, %p97_p2  ;;  %s545_s21 = smov 8  }
   0xb   : > { %s335_s22 = sadd.s32 4294967294, %s541_s12   ;;  %s602_s23 = sadd.s32 1, %s541_s12  }
   0xc   : > { %p359_p4 = pneg %p591_p3  ;;  %s26_s24 = sadd.s32 1, %s537_s11 }
   0xd   : > { %s23_s25 = ssub.s32 %s541_s12, %s602_s23  ;;  %p33_p7 = scmp.ne.s32.totalorder %s537_s11, %s533_s10 }
   0xe   : > { %p360_p6 = pnand %p359_p4, %p40_p1  ;;  %p24_p8 = scmp.eq.s32.totalorder %s23_s25, 0 }
   0xf   : > { %p34_p9 = scmp.eq.s32.totalorder %s541_s12, 0  ;;  %p39_p10 = scmp.ne.s32.totalorder %s533_s10, %s529_s9 }
  0x10   : > { %362 = dma.hbm_to_vmem [thread:$0]  (!%p360_p6), %s109_s15, 2048, %s111_s19, [#allocation6], %s544_s20, %s544_s20, %s545_s21  }
  0x11   : > { %p84_p11 = scmp.eq.s32.totalorder %s586_s16, 1  ;;  %p618_p12 = por %p40_p1, %p39_p10 }
  0x12   : > { %s614_s26 = scalar_select %p24_p8, %s537_s11, %s26_s24  }
  0x13   : > { %p622_p13 = por %p84_p11, %p33_p7  ;;  %p90_p0 = scmp.eq.s32.totalorder %s335_s22, 1 }
  0x14   : > { %p35_p2 = por %p34_p9, %p33_p7  ;;  %s124_s29 = sand.u32 1, %s537_s11  }
  0x15   : > { %p627_p4 = por %p90_p0, %p39_p10  ;;  %p372_p6 = scmp.lt.s32.totalorder %s541_s12, 2 }
  0x16   : > { %s339_s3 = sshll.u32 %s124_s29, 3  ;;  %s340_s4 = sshll.u32 %s541_s12, 3 }
  0x17   : > { %s132_s7 = scalar_lea.hbm %s702_s0, %s340_s4  ;;  %s128_s13 = scalar_lea.vmem [#allocation2], %s339_s3 }
  0x18   : > { %s134_s8 = sshll.u32 %s132_s7, 4  ;;  %s136_s14 = sshll.u32 %s128_s13, 4  ;;  %s135_s8 = int_to_ptr.hbm [resolvable:$true] %s134_s8  ;;  %s137_s14 = int_to_ptr.vmem [resolvable:$true] %s136_s14 }
  0x19   : > { %p636_p8 = pnand %p372_p6, %p35_p2  ;;  %s125_s18 = scalar_lea.sflag [#allocation3], %s124_s29 }
  0x1a   : > { %s441_s19 = sshra.s32 %s135_s8, 4  ;;  %s448_s24 = scalar_lea.hbm %s702_s0, 16  ;;  %s442_s19 = int_to_ptr.hbm [resolvable:$true] %s441_s19 }
  0x1b   : > { %s443_s20 = scalar_lea.hbm %s442_s19, 8  ;;  %p445_p9 = pneg %p636_p8 }
  0x1c   : > { %p444_p7 = scmp.ne.s32.totalorder %s442_s19, %s443_s20  ;;  %p449_p0 = scmp.lt.s32.totalorder %s442_s19, %s702_s0 }
  0x1d   : > { %p450_p2 = scmp.lt.s32.totalorder %s448_s24, %s443_s20 }
  0x1e   : > { %p446_p10 = pnand %p445_p9, %p444_p7 }
  0x1f   : > { %p451_p6 = por %p450_p2, %p449_p0 }
  0x20   : > { %p447_p11 = pneg %p446_p10 }
  0x22   : > { %p452_p5 = pnand %p451_p6, %p447_p11 }
  0x24   : > { %455 = shalt.err (!%p452_p5)
}
  0x25   : > { %366 = dma.hbm_to_vmem [thread:$0]  (!%p636_p8), %s135_s8, 128, %s137_s14, %s125_s18  }
  0x26   : > { %145 = sbr.rel (%p591_p3) target bundleno = 537 (0x219), region = 28  ;;  %s653_s29 = sand.u32 (!%p591_p3), 1, %s533_s10  }
  0x27   : > { %s342_s4 = sshll.u32 (!%p591_p3), %s653_s29, 3  ;;  %s148_s5 = scalar_lea.sflag (!%p591_p3), [#allocation3], %s653_s29 }
  0x28   : > { %s151_s6 = scalar_lea.vmem (!%p591_p3), [#allocation2], %s342_s4 }
  0x2b   : > { %516 = dma.done.wait (%p618_p12), %s148_s5, 128  }
  0x2c   : > { %518 = vsyncadd (%p618_p12), %s148_s5, 4294967168 }
  0x2d   : > { %520 = dma.done.wait (%p40_p1), [#allocation6], 2048  }
  0x2e   : > { %522 = vsyncadd (%p40_p1), [#allocation6], 4294965248  ;;  %v178_v0 = vld [vmem:[%s151_s6] sm:$0xff]  ;;  %v179_v1 = vlaneseq  ;;  %v215_v9 = vld [vmem:[#allocation5 + $0x68] sm:$0xff]  ;;  %v546_v32 = vmov 1.0   ;;  %s348_s17 = sshll.u32 %s586_s16, 3 }
  0x2f   : > { %181 = vmax.xlane.f32.xlu0 %v178_v0  ;;  %v217_v7 = vld [vmem:[#allocation5 + $0x78] sm:$0xff]  ;;  %v216_v8 = vld [vmem:[#allocation5 + $0x70] sm:$0xff]  ;;  %v214_v10 = vld [vmem:[#allocation5 + $0x60] sm:$0xff]  ;;  %s250_s8 = scalar_lea.hbm %s704_s2, %s348_s17  ;;  %s177_s13 = scalar_lea.vmem [#allocation7], %s342_s4 }
  0x30   : > { %v180_v2 = vand.u32 127, %v179_v1  ;;  %218 = vmatpush.msra.mxu0 %v217_v7  ;;  %v213_v11 = vld [vmem:[#allocation5 + $0x58] sm:$0xff]  ;;  %v212_v12 = vld [vmem:[#allocation5 + $0x50] sm:$0xff]  ;;  %v211_v13 = vld [vmem:[#allocation5 + $0x48] sm:$0xff]  ;;  %s252_s14 = sshll.u32 %s177_s13, 4  ;;  %s254_s15 = sshll.u32 %s250_s8, 4  ;;  %s253_s14 = int_to_ptr.vmem [resolvable:$true] %s252_s14  ;;  %s255_s15 = int_to_ptr.hbm [resolvable:$true] %s254_s15 }
  0x31   : > { %v210_v14 = vld [vmem:[#allocation5 + $0x40] sm:$0xff]  ;;  %v209_v15 = vld [vmem:[#allocation5 + $0x38] sm:$0xff]  ;;  %v208_v16 = vld [vmem:[#allocation5 + $0x30] sm:$0xff]  ;;  %s240_s18 = scalar_lea.sflag [#allocation4], %s653_s29  ;;  %s485_s19 = sshra.s32 %s255_s15, 4  ;;  %s486_s19 = int_to_ptr.hbm [resolvable:$true] %s485_s19 }
  0x32   : > { %219 = vmatpush.msra.mxu0 %v216_v8  ;;  %v207_v17 = vld [vmem:[#allocation5 + $0x28] sm:$0xff]  ;;  %v206_v18 = vld [vmem:[#allocation5 + $0x20] sm:$0xff]  ;;  %v205_v19 = vld [vmem:[#allocation5 + $0x18] sm:$0xff]  ;;  %s487_s20 = scalar_lea.hbm %s486_s19, 8  ;;  %s491_s22 = scalar_lea.hbm %s704_s2, 16 }
  0x33   : > { %v204_v24 = vld [vmem:[#allocation5 + $0x10] sm:$0xff]  ;;  %v203_v25 = vld [vmem:[#allocation5 + $0x8] sm:$0xff]  ;;  %v202_v26 = vld [vmem:[#allocation5] sm:$0xff]  ;;  %p488_p1 = scmp.ne.s32.totalorder %s486_s19, %s487_s20  ;;  %p492_p12 = scmp.lt.s32.totalorder %s486_s19, %s704_s2 }
  0x34   : > { %220 = vmatpush.msra.mxu0 %v215_v9  ;;  %p493_p8 = scmp.lt.s32.totalorder %s491_s22, %s487_s20 }
  0x35   : > { %p489_p3 = pnand %p488_p1, %p622_p13 }
  0x36   : > { %221 = vmatpush.msra.mxu0 %v214_v10  ;;  %p494_p7 = por %p493_p8, %p492_p12 }
  0x37   : > { %p490_p5 = pneg %p489_p3 }
  0x38   : > { %222 = vmatpush.msra.mxu0 %v213_v11 }
  0x39   : > { %p495_p9 = pnand %p494_p7, %p490_p5 }
  0x3a   : > { %223 = vmatpush.msra.mxu0 %v212_v12 }
  0x3c   : > { %224 = vmatpush.msra.mxu0 %v211_v13 }
  0x3e   : > { %225 = vmatpush.msra.mxu0 %v210_v14 }
  0x40   : > { %226 = vmatpush.msra.mxu0 %v209_v15 }
  0x42   : > { %227 = vmatpush.msra.mxu0 %v208_v16 }
  0x44   : > { %228 = vmatpush.msra.mxu0 %v207_v17 }
  0x46   : > { %229 = vmatpush.msra.mxu0 %v206_v18 }
  0x48   : > { %230 = vmatpush.msra.mxu0 %v205_v19 }
  0x4a   : > { %231 = vmatpush.msra.mxu0 %v204_v24 }
  0x4c   : > { %232 = vmatpush.msra.mxu0 %v203_v25 }
  0x4e   : > { %233 = vmatpush.msra.mxu0 %v202_v26 }
  0xa2   : > { %v182_v3 = vpop.xlane.xlu0 %181 }
  0xa3   : > { %vm183_vm0 = vcmp.eq.f32.partialorder %v178_v0, %v182_v3 }
  0xa4   : > { %v184_v4 = vsel %vm183_vm0, %v180_v2, 128 }
  0xa5   : > { %v186_v5 = vshra.s32 %v184_v4, 16  ;;  %v185_v20 = vand.u32 65535, %v184_v4 }
  0xa7   : > { %v188_v6 = vcvt.s32.f32 %v186_v5  ;;  %v187_v22 = vcvt.s32.f32 %v185_v20 }
  0xa9   : > { %189 = vmin.xlane.f32.xlu0 %v188_v6 }
 0x11c   : > { %v190_v21 = vpop.xlane.xlu0 %189 }
 0x11d   : > { %vm191_vm1 = vcmp.eq.f32.partialorder %v188_v6, %v190_v21  ;;  %v196_v27 = vcvt.f32.s32 %v190_v21 }
 0x11e   : > { %v192_v23 = vsel %vm191_vm1, %v187_v22, inf }
 0x11f   : > { %193 = vmin.xlane.f32.xlu1 %v192_v23  ;;  %v197_v29 = vshll.u32 %v196_v27, 16 }
 0x192   : > { %v194_v28 = vpop.xlane.xlu1 %193 }
 0x193   : > { %v195_v30 = vcvt.f32.s32 %v194_v28 }
 0x195   : > { %v198_v31 = vadd.s32 %v197_v29, %v195_v30 }
 0x197   : > { %vm199_vm2 = vcmp.eq.s32.totalorder %v180_v2, %v198_v31 }
 0x198   : > { %346 = vmatmul.msk.f32.vlgmr.msra.gmra.mxu0 %vm199_vm2, %v546_v32 }
 0x215   : > { %v235_v33 = vpop.f32.mrf.mxu0 }
 0x216   : > { %238 = vst [vmem:[%s177_s13] sm:$0xff] %v235_v33 }
 0x217   : > { %498 = shalt.err (!%p495_p9)
}
 0x218   : > { %357 = dma.vmem_to_hbm [thread:$0]  (%p622_p13), %s253_s14, 128, %s255_s15, %s240_s18  }
 0x219 PF: > { %s266_s3 = sand.u32 1, %s529_s9   ;;  %p710_p10 = scmp.ge.s32.totalorder %s541_s12, 2 }
 0x21a   : > { %s267_s29 = scalar_lea.sflag [#allocation4], %s266_s3 }
 0x21b   : > { %p368_p11 = pnand %p710_p10, %p627_p4 }
 0x21d   : > { %p369_p0 = pneg %p368_p11 }
 0x21f   : > { %524 = dma.done.wait (%p369_p0), %s267_s29, 128  }
 0x220   : > { %526 = vsyncadd (%p369_p0), %s267_s29, 4294967168  ;;  %p16_p2 = scmp.ge.s32.totalorder %s602_s23, 4   ;;  %s711_s9 = smov %s533_s10 }
 0x221   : > { %s712_s10 = smov %s537_s11  ;;  %s713_s11 = smov %s614_s26 }
 0x222   : > { %s714_s12 = smov %s602_s23  ;;  %18 = sbr.rel (!%p16_p2) target bundleno = 6 (0x6), region = 77 }
 0x227   :  { %273 = vsyncpa [#allocation3], 1 }
 0x228   :  { %275 = vsyncpa [#allocation3 + $0x1], 1 }
 0x229   :  { %276 = vsyncpa [#allocation6], 1 }
 0x22a   :  { %277 = vsyncpa [#allocation4], 1 }
 0x22b   :  { %279 = vsyncpa [#allocation4 + $0x1], 1 }

</bundles_post_ra>
